<compile_context>
chip_gen: v7x
topology: tpu7x:2x2x1
jax: 0.10.0
libtpu: 0.0.40
codegen_flags: <defaults>
</compile_context>

<pallas_src>
import functools

import jax
import jax.numpy as jnp
from jax.experimental import pallas as pl
from jax.experimental.pallas import tpu as pltpu


def _pair(v):
    return (int(v), int(v)) if isinstance(v, int) else (int(v[0]), int(v[1]))


def _make_lrpad_kernel(C, H, W, ph, pw):
    """Build the per-batch-element LRPad kernel (all sizes static)."""
    Hp, Wp = H + 2 * ph, W + 2 * pw

    def kernel(x_ref, o_ref):
        # x_ref : (1, C, H,  W )  one batch element
        # o_ref : (1, C, Hp, Wp)  padded output for the same element
        x = x_ref[0]  # (C, H, W)

        # Zero-padded top / bottom rows (full output width -> widest store).
        if ph > 0:
            zeros = jnp.zeros((C, ph, Wp), o_ref.dtype)
            o_ref[0, :, 0:ph, :] = zeros
            o_ref[0, :, ph + H:Hp, :] = zeros

        # Interior rows: bulk copy plus circular wrap along W, all as direct
        # sliced stores (no concatenate / VMEM relayout).
        o_ref[0, :, ph:ph + H, pw:pw + W] = x
        if pw > 0:
            o_ref[0, :, ph:ph + H, 0:pw] = x[:, :, W - pw:W]       # wrap left
            o_ref[0, :, ph:ph + H, pw + W:Wp] = x[:, :, 0:pw]      # wrap right

    return kernel


@functools.partial(jax.jit, static_argnames=("padding",))
def lr_pad(x, padding):
    """LRPad forward.

    x       : (N, C, H, W)  NCHW, like PyTorch
    padding : int or (h, w)
    returns : (N, C, H + 2h, W + 2w)
    """
    ph, pw = _pair(padding)
    N, C, H, W = x.shape
    assert H % 2 == 0 and W % 2 == 0, "LRPad requires even H and W"
    if ph == 0 and pw == 0:
        return x
    assert pw <= W, "circular pad width must not exceed W"

    Hp, Wp = H + 2 * ph, W + 2 * pw
    kernel = _make_lrpad_kernel(C, H, W, ph, pw)

    return pl.pallas_call(
        kernel,
        out_shape=jax.ShapeDtypeStruct((N, C, Hp, Wp), x.dtype),
        grid_spec=pltpu.PrefetchScalarGridSpec(
            num_scalar_prefetch=0,
            grid=(N,),
            in_specs=[pl.BlockSpec((1, C, H, W), lambda n: (n, 0, 0, 0))],
            out_specs=pl.BlockSpec((1, C, Hp, Wp), lambda n: (n, 0, 0, 0)),
        ),
        compiler_params=pltpu.CompilerParams(
            dimension_semantics=("parallel",)),
    )(x)


def _reference_lrpad(x, padding):
    ph, pw = _pair(padding)
    if ph == 0 and pw == 0:
        return x
    ref = jnp.pad(x, ((0, 0), (0, 0), (0, 0), (pw, pw)), mode="wrap")
    ref = jnp.pad(ref, ((0, 0), (0, 0), (ph, ph), (0, 0)))
    return ref


if __name__ == "__main__":
    # LRPad(padding=1) on x: (2, 4, 16, 16)
    N, C, H, W = 2, 4, 16, 16
    key = jax.random.PRNGKey(0)
    x = jax.random.normal(key, (N, C, H, W), jnp.float32)

    # Case 1: symmetric padding (int)
    out = jax.block_until_ready(lr_pad(x, 1))
    ref = _reference_lrpad(x, 1)
    assert out.shape == ref.shape, (out.shape, ref.shape)
    assert jnp.array_equal(out, ref), "mismatch vs reference (padding=1)"

    # Case 2: asymmetric padding tuple (h, w)
    out2 = jax.block_until_ready(lr_pad(x, (2, 3)))
    ref2 = _reference_lrpad(x, (2, 3))
    assert out2.shape == ref2.shape, (out2.shape, ref2.shape)
    assert jnp.array_equal(out2, ref2), "mismatch vs reference (padding=(2,3))"

    print("KERNEL_OK")
</pallas_src>

<mosaic_0001>
module attributes {stable_mosaic.version = 11 : i64} {
  func.func @kernel(%arg0: i32, %arg1: memref<1x4x16x16xf32, #tpu.memory_space<vmem>>, %arg2: memref<1x4x18x18xf32, #tpu.memory_space<vmem>>) attributes {dimension_semantics = [#tpu.dimension_semantics<parallel>], iteration_bounds = array<i64: 2>, scalar_prefetch = 0 : i64, scratch_operands = 0 : i64, tpu.core_type = #tpu.core_type<tc>, window_params = [{transform_indices = @transform_0, window_bounds = array<i64: 1, 4, 16, 16>}, {transform_indices = @transform_1, window_bounds = array<i64: 1, 4, 18, 18>}]} {
    %c0 = arith.constant 0 : index
    %c0_0 = arith.constant 0 : index
    %c0_1 = arith.constant 0 : index
    %c0_2 = arith.constant 0 : index
    %0 = vector.load %arg1[%c0, %c0_0, %c0_1, %c0_2] : memref<1x4x16x16xf32, #tpu.memory_space<vmem>>, vector<1x4x16x16xf32>
    %1 = vector.shape_cast %0 : vector<1x4x16x16xf32> to vector<4x16x16xf32>
    %cst = arith.constant 0.000000e+00 : f32
    %2 = vector.broadcast %cst : f32 to vector<4x1x18xf32>
    %c0_3 = arith.constant 0 : index
    %c0_4 = arith.constant 0 : index
    %c0_5 = arith.constant 0 : index
    %c0_6 = arith.constant 0 : index
    %3 = vector.load %arg2[%c0_3, %c0_4, %c0_5, %c0_6] : memref<1x4x18x18xf32, #tpu.memory_space<vmem>>, vector<1x4x1x18xf32>
    %4 = vector.shape_cast %3 : vector<1x4x1x18xf32> to vector<4x1x18xf32>
    %5 = vector.shape_cast %2 : vector<4x1x18xf32> to vector<1x4x1x18xf32>
    tpu.vector_store %arg2[%c0_3, %c0_4, %c0_5, %c0_6], %5 {strides = array<i32>} : memref<1x4x18x18xf32, #tpu.memory_space<vmem>>, vector<1x4x1x18xf32>,
    %c0_7 = arith.constant 0 : index
    %c0_8 = arith.constant 0 : index
    %c17 = arith.constant 17 : index
    %c0_9 = arith.constant 0 : index
    %6 = vector.load %arg2[%c0_7, %c0_8, %c17, %c0_9] : memref<1x4x18x18xf32, #tpu.memory_space<vmem>>, vector<1x4x1x18xf32>
    %7 = vector.shape_cast %6 : vector<1x4x1x18xf32> to vector<4x1x18xf32>
    %8 = vector.shape_cast %2 : vector<4x1x18xf32> to vector<1x4x1x18xf32>
    tpu.vector_store %arg2[%c0_7, %c0_8, %c17, %c0_9], %8 {strides = array<i32>} : memref<1x4x18x18xf32, #tpu.memory_space<vmem>>, vector<1x4x1x18xf32>,
    %c0_10 = arith.constant 0 : index
    %c0_11 = arith.constant 0 : index
    %c1 = arith.constant 1 : index
    %c1_12 = arith.constant 1 : index
    %9 = vector.load %arg2[%c0_10, %c0_11, %c1, %c1_12] : memref<1x4x18x18xf32, #tpu.memory_space<vmem>>, vector<1x4x16x16xf32>
    %10 = vector.shape_cast %9 : vector<1x4x16x16xf32> to vector<4x16x16xf32>
    %11 = vector.shape_cast %1 : vector<4x16x16xf32> to vector<1x4x16x16xf32>
    tpu.vector_store %arg2[%c0_10, %c0_11, %c1, %c1_12], %11 {strides = array<i32>} : memref<1x4x18x18xf32, #tpu.memory_space<vmem>>, vector<1x4x16x16xf32>,
    %12 = vector.extract_strided_slice %1 {offsets = [0, 0, 15], sizes = [4, 16, 1], strides = [1, 1, 1]} : vector<4x16x16xf32> to vector<4x16x1xf32>
    %c0_13 = arith.constant 0 : index
    %c0_14 = arith.constant 0 : index
    %c1_15 = arith.constant 1 : index
    %c0_16 = arith.constant 0 : index
    %13 = vector.load %arg2[%c0_13, %c0_14, %c1_15, %c0_16] : memref<1x4x18x18xf32, #tpu.memory_space<vmem>>, vector<1x4x16x1xf32>
    %14 = vector.shape_cast %13 : vector<1x4x16x1xf32> to vector<4x16x1xf32>
    %15 = vector.shape_cast %12 : vector<4x16x1xf32> to vector<1x4x16x1xf32>
    tpu.vector_store %arg2[%c0_13, %c0_14, %c1_15, %c0_16], %15 {strides = array<i32>} : memref<1x4x18x18xf32, #tpu.memory_space<vmem>>, vector<1x4x16x1xf32>,
    %16 = vector.extract_strided_slice %1 {offsets = [0, 0, 0], sizes = [4, 16, 1], strides = [1, 1, 1]} : vector<4x16x16xf32> to vector<4x16x1xf32>
    %c0_17 = arith.constant 0 : index
    %c0_18 = arith.constant 0 : index
    %c1_19 = arith.constant 1 : index
    %c17_20 = arith.constant 17 : index
    %17 = vector.load %arg2[%c0_17, %c0_18, %c1_19, %c17_20] : memref<1x4x18x18xf32, #tpu.memory_space<vmem>>, vector<1x4x16x1xf32>
    %18 = vector.shape_cast %17 : vector<1x4x16x1xf32> to vector<4x16x1xf32>
    %19 = vector.shape_cast %16 : vector<4x16x1xf32> to vector<1x4x16x1xf32>
    tpu.vector_store %arg2[%c0_17, %c0_18, %c1_19, %c17_20], %19 {strides = array<i32>} : memref<1x4x18x18xf32, #tpu.memory_space<vmem>>, vector<1x4x16x1xf32>,
    return
  }
  func.func @transform_0(%arg0: i32) -> (i32, i32, i32, i32) {
    %c0_i32 = arith.constant 0 : i32
    %c0_i32_0 = arith.constant 0 : i32
    %c0_i32_1 = arith.constant 0 : i32
    %c0_i32_2 = arith.constant 0 : i32
    return %arg0, %c0_i32, %c0_i32_0, %c0_i32_1 : i32, i32, i32, i32
  }
  func.func @transform_1(%arg0: i32) -> (i32, i32, i32, i32) {
    %c0_i32 = arith.constant 0 : i32
    %c0_i32_0 = arith.constant 0 : i32
    %c0_i32_1 = arith.constant 0 : i32
    %c0_i32_2 = arith.constant 0 : i32
    return %arg0, %c0_i32, %c0_i32_0, %c0_i32_1 : i32, i32, i32, i32
  }
}

</mosaic_0001>

<bundles_post_ra>
// kernel: lr_pad.1
= control target key start
LH: loop header
LB: loop body
LE: loop exit
PB: predicated region body
PF: predicated region fallthrough
CT: control target
= control target key end

     0   :  { %6 = vsyncpa [#allocation3], 0  ;;  %s645_s0 = inlined_call_operand.hbm [shape: f32[2,4,16,16], index: 0, kind: input, shape index: {}]   ;;  %s646_s1 = inlined_call_operand.vmem [shape: f32[2,4,18,18], index: 1, kind: output, shape index: {}]  }
   0x1   :  { %8 = vsyncpa [#allocation3 + $0x1], 0  ;;  %s469_s6 = smov 0   ;;  %s471_s7 = smov 0  }
   0x2   :  { %s473_s8 = smov 0   ;;  %s475_s9 = smov 0  }
   0x3 LB: > { %s488_s10 = sadd.s32 4294967295, %s450_s9   ;;  %s491_s11 = sadd.s32 1, %s450_s9   ;;  %s450_s9 = sphi %s475_s9, %s653_s9   ;;  %s446_s8 = sphi %s473_s8, %s652_s8   ;;  %s442_s7 = sphi %s471_s7, %s651_s7   ;;  %s438_s6 = sphi %s469_s6, %s650_s6  }
   0x4   : > { %s18_s12 = ssub.s32 %s450_s9, %s491_s11  ;;  %s21_s13 = sadd.s32 1, %s446_s8 }
   0x5   : > { %p19_p0 = scmp.eq.s32.totalorder %s18_s12, 0  ;;  %p28_p1 = scmp.ne.s32.totalorder %s446_s8, %s442_s7 }
   0x6   : > { %p29_p2 = scmp.eq.s32.totalorder %s450_s9, 0  ;;  %p34_p3 = scmp.ne.s32.totalorder %s442_s7, %s438_s6 }
   0x7   : > { %s501_s14 = scalar_select %p19_p0, %s446_s8, %s21_s13  }
   0x8   : > { %p30_p4 = por %p29_p2, %p28_p1  ;;  %p35_p5 = scmp.eq.s32.totalorder %s488_s10, 0 }
   0x9   : > { %p347_p6 = scmp.lt.s32.totalorder %s450_s9, 2  ;;  %s84_s16 = sand.u32 1, %s446_s8  }
   0xa   : > { %p505_p7 = por %p35_p5, %p34_p3  ;;  %s331_s17 = sshll.u32 %s84_s16, 6 }
   0xb   : > { %s339_s18 = sshll.u32 %s450_s9, 10  ;;  %s88_s22 = scalar_lea.vmem [#allocation2], %s331_s17 }
   0xc   : > { %s514_s21 = scalar_lea.hbm %s645_s0, %s339_s18  ;;  %s95_s23 = sshll.u32 %s88_s22, 4  ;;  %s516_s23 = int_to_ptr.vmem [resolvable:$true] %s95_s23 }
   0xd   : > { %p518_p8 = pnand %p347_p6, %p30_p4  ;;  %s523_s25 = scalar_lea.sflag [#allocation3], %s84_s16 }
   0xe   : > { %s386_s26 = scalar_lea.hbm %s514_s21, 1024  ;;  %s391_s29 = scalar_lea.hbm %s645_s0, 2048 }
   0xf   : > { %p387_p10 = scmp.ne.s32.totalorder %s514_s21, %s386_s26  ;;  %p388_p11 = pneg %p518_p8 }
  0x10   : > { %p392_p0 = scmp.lt.u32.totalorder %s514_s21, %s645_s0  ;;  %p393_p1 = scmp.lt.u32.totalorder %s391_s29, %s386_s26 }
  0x11   : > { %p389_p12 = pnand %p388_p11, %p387_p10  ;;  %p395_p3 = scmp.lt.u32.totalorder %s386_s26, %s514_s21 }
  0x12   : > { %p394_p2 = por %p393_p1, %p392_p0 }
  0x13   : > { %p390_p13 = pneg %p389_p12 }
  0x14   : > { %p396_p4 = por %p395_p3, %p394_p2 }
  0x16   : > { %p397_p5 = pnand %p396_p4, %p390_p13 }
  0x18   : > { %400 = shalt.err (!%p397_p5)
}
  0x19   : > { %s401_s3 = scalar_lea.vmem %s516_s23, 1024  ;;  %s452_s4 = smov [#allocation2]  }
  0x1a   : > { %p402_p6 = scmp.ne.s32.totalorder %s516_s23, %s401_s3  ;;  %s406_s5 = sshll.u32 %s452_s4, 4  ;;  %s407_s5 = int_to_ptr.vmem [resolvable:$false] %s406_s5 }
  0x1b   : > { %s408_s6 = scalar_lea.vmem %s407_s5, 2048  ;;  %p409_p9 = scmp.lt.s32.totalorder %s516_s23, %s407_s5 }
  0x1c   : > { %p404_p10 = pnand %p402_p6, %p388_p11  ;;  %p410_p0 = scmp.lt.s32.totalorder %s408_s6, %s401_s3 }
  0x1e   : > { %p405_p12 = pneg %p404_p10  ;;  %p411_p1 = por %p410_p0, %p409_p9 }
  0x20   : > { %p412_p2 = pnand %p411_p1, %p405_p12 }
  0x22   : > { %415 = shalt.err (!%p412_p2)
}
  0x23   : > { %s453_s12 = smov 128   ;;  %s454_s13 = smov 8  }
  0x24   : > { %346 = dma.hbm_to_vmem [thread:$0]  (!%p518_p8), %s514_s21, 1024, %s516_s23, %s523_s25, %s453_s12, %s453_s12, %s454_s13  }
  0x25   : > { %p103_p11 = scmp.lt.s32.totalorder %s450_s9, 3  ;;  %p649_p13 = scmp.ge.s32.totalorder %s450_s9, 1 }
  0x27   : > { %p104_p3 = pnand %p649_p13, %p103_p11 }
  0x28   : > { %s109_s16 = sand.u32 (!%p104_p3), 1, %s442_s7  }
  0x29   : > { %107 = sbr.rel (%p104_p3) target bundleno = 213 (0xd5), region = 24  ;;  %s335_s17 = sshll.u32 (!%p104_p3), %s109_s16, 6 }
  0x2a   : > { %s110_s18 = scalar_lea.sflag (!%p104_p3), [#allocation3], %s109_s16  ;;  %s555_s19 = scalar_lea.vmem (!%p104_p3), [#allocation2], %s335_s17 }
  0x30   : > { %433 = dma.done.wait (%p505_p7), %s110_s18, 1024  }
  0x31   : > { %435 = vsyncadd (%p505_p7), %s110_s18, 4294966272  ;;  %p132_p8 = scmp.lt.s32.totalorder %s488_s10, 1  ;;  %vm145_vm0 = vcmask 139264   ;;  %v455_v0 = vmov 0.0   ;;  %v139_v1 = vld [vmem:[%s555_s19 + $0x10] sm:$0xff]  ;;  %v137_v2 = vld [vmem:[%s555_s19] sm:$0xff] }
  0x32   : > { %v140_v3 = vld [vmem:[%s555_s19 + $0x18] sm:$0xff]  ;;  %v138_v4 = vld [vmem:[%s555_s19 + $0x8] sm:$0xff]  ;;  %v141_v6 = vld [vmem:[%s555_s19 + $0x20] sm:$0xff]  ;;  %s457_s15 = smov 113   ;;  %s458_s23 = smov 17   ;;  %vm186_vm1 = vcmask 138248  }
  0x33   : > { %s655_s10 = smov (!%p132_p8, %s488_s10), 1  ;;  %v142_v5 = vld [vmem:[%s555_s19 + $0x28] sm:$0xff]  ;;  %v144_v7 = vld [vmem:[%s555_s19 + $0x38] sm:$0xff]  ;;  %v143_v8 = vld [vmem:[%s555_s19 + $0x30] sm:$0xff]  ;;  %vm219_vm2 = vcmask 7168   ;;  %vm252_vm3 = vcmask 146568  }
  0x34   : > { %s340_s9 = smul.u32 96, %s655_s10  ;;  %s456_s10 = smov 1  }
  0x35   : > { %166 = vrot.lane.b32.xlu1 %v139_v1, %s456_s10  ;;  %162 = vrot.lane.b32.xlu0 %v137_v2, %s456_s10 }
  0x36   : > { %s566_s22 = scalar_lea.vmem %s646_s1, %s340_s9 }
  0x37   : > { %146 = vst.msk [vmem:[%s566_s22] sm:$0x1] %vm145_vm0, %v455_v0  ;;  %147 = vst.msk [vmem:[%s566_s22 + $0x18] sm:$0x1] %vm145_vm0, %v455_v0 }
  0x38   : > { %148 = vst.msk [vmem:[%s566_s22 + $0x30] sm:$0x1] %vm145_vm0, %v455_v0  ;;  %149 = vst.msk [vmem:[%s566_s22 + $0x48] sm:$0x1] %vm145_vm0, %v455_v0 }
  0x39   : > { %150 = vst.msk [vmem:[%s566_s22 + $0x11] sm:$0x1] %vm145_vm0, %v455_v0  ;;  %151 = vst.msk [vmem:[%s566_s22 + $0x29] sm:$0x1] %vm145_vm0, %v455_v0  ;;  %168 = vrot.lane.b32.xlu1 %v140_v3, %s456_s10  ;;  %164 = vrot.lane.b32.xlu0 %v138_v4, %s456_s10 }
  0x3a   : > { %152 = vst.msk [vmem:[%s566_s22 + $0x41] sm:$0x1] %vm145_vm0, %v455_v0  ;;  %153 = vst.msk [vmem:[%s566_s22 + $0x59] sm:$0x1] %vm145_vm0, %v455_v0 }
  0x3d   : > { %172 = vrot.lane.b32.xlu1 %v142_v5, %s456_s10  ;;  %170 = vrot.lane.b32.xlu0 %v141_v6, %s456_s10 }
  0x41   : > { %176 = vrot.lane.b32.xlu1 %v144_v7, %s456_s10  ;;  %174 = vrot.lane.b32.xlu0 %v143_v8, %s456_s10 }
  0x45   : > { %197 = vrot.lane.b32.xlu1 %v138_v4, %s457_s15  ;;  %195 = vrot.lane.b32.xlu0 %v137_v2, %s457_s15 }
  0x49   : > { %201 = vrot.lane.b32.xlu1 %v140_v3, %s457_s15  ;;  %199 = vrot.lane.b32.xlu0 %v139_v1, %s457_s15 }
  0x4d   : > { %205 = vrot.lane.b32.xlu1 %v142_v5, %s457_s15  ;;  %203 = vrot.lane.b32.xlu0 %v141_v6, %s457_s15 }
  0x51   : > { %209 = vrot.lane.b32.xlu1 %v144_v7, %s457_s15  ;;  %207 = vrot.lane.b32.xlu0 %v143_v8, %s457_s15 }
  0x55   : > { %230 = vrot.lane.b32.xlu1 %v138_v4, %s458_s23  ;;  %228 = vrot.lane.b32.xlu0 %v137_v2, %s458_s23 }
  0x59   : > { %234 = vrot.lane.b32.xlu1 %v140_v3, %s458_s23  ;;  %232 = vrot.lane.b32.xlu0 %v139_v1, %s458_s23 }
  0x5d   : > { %238 = vrot.lane.b32.xlu1 %v142_v5, %s458_s23  ;;  %236 = vrot.lane.b32.xlu0 %v141_v6, %s458_s23 }
  0x61   : > { %242 = vrot.lane.b32.xlu1 %v144_v7, %s458_s23  ;;  %240 = vrot.lane.b32.xlu0 %v143_v8, %s458_s23 }
  0xa7   : > { %v167_v9 = vpop.permute.xlu1 %166  ;;  %v163_v10 = vpop.permute.xlu0 %162 }
  0xa8   : > { %189 = vst.msk [vmem:[%s566_s22 + $0x19] sm:$0xff] %vm186_vm1, %v167_v9  ;;  %187 = vst.msk [vmem:[%s566_s22 + $0x1] sm:$0xff] %vm186_vm1, %v163_v10 }
  0xab   : > { %v169_v11 = vpop.permute.xlu1 %168  ;;  %v165_v12 = vpop.permute.xlu0 %164 }
  0xac   : > { %190 = vst.msk [vmem:[%s566_s22 + $0x21] sm:$0xff] %vm186_vm1, %v169_v11  ;;  %188 = vst.msk [vmem:[%s566_s22 + $0x9] sm:$0xff] %vm186_vm1, %v165_v12 }
  0xaf   : > { %v173_v13 = vpop.permute.xlu1 %172  ;;  %v171_v14 = vpop.permute.xlu0 %170 }
  0xb0   : > { %192 = vst.msk [vmem:[%s566_s22 + $0x39] sm:$0xff] %vm186_vm1, %v173_v13  ;;  %191 = vst.msk [vmem:[%s566_s22 + $0x31] sm:$0xff] %vm186_vm1, %v171_v14 }
  0xb3   : > { %v177_v15 = vpop.permute.xlu1 %176  ;;  %v175_v16 = vpop.permute.xlu0 %174 }
  0xb4   : > { %194 = vst.msk [vmem:[%s566_s22 + $0x51] sm:$0xff] %vm186_vm1, %v177_v15  ;;  %193 = vst.msk [vmem:[%s566_s22 + $0x49] sm:$0xff] %vm186_vm1, %v175_v16 }
  0xb7   : > { %v198_v17 = vpop.permute.xlu1 %197  ;;  %v196_v18 = vpop.permute.xlu0 %195 }
  0xb8   : > { %221 = vst.msk [vmem:[%s566_s22 + $0x9] sm:$0xff] %vm219_vm2, %v198_v17  ;;  %220 = vst.msk [vmem:[%s566_s22 + $0x1] sm:$0xff] %vm219_vm2, %v196_v18 }
  0xbb   : > { %v202_v19 = vpop.permute.xlu1 %201  ;;  %v200_v20 = vpop.permute.xlu0 %199 }
  0xbc   : > { %223 = vst.msk [vmem:[%s566_s22 + $0x21] sm:$0xff] %vm219_vm2, %v202_v19  ;;  %222 = vst.msk [vmem:[%s566_s22 + $0x19] sm:$0xff] %vm219_vm2, %v200_v20 }
  0xbf   : > { %v206_v21 = vpop.permute.xlu1 %205  ;;  %v204_v22 = vpop.permute.xlu0 %203 }
  0xc0   : > { %225 = vst.msk [vmem:[%s566_s22 + $0x39] sm:$0xff] %vm219_vm2, %v206_v21  ;;  %224 = vst.msk [vmem:[%s566_s22 + $0x31] sm:$0xff] %vm219_vm2, %v204_v22 }
  0xc3   : > { %v210_v23 = vpop.permute.xlu1 %209  ;;  %v208_v24 = vpop.permute.xlu0 %207 }
  0xc4   : > { %227 = vst.msk [vmem:[%s566_s22 + $0x51] sm:$0xff] %vm219_vm2, %v210_v23  ;;  %226 = vst.msk [vmem:[%s566_s22 + $0x49] sm:$0xff] %vm219_vm2, %v208_v24 }
  0xc7   : > { %v231_v25 = vpop.permute.xlu1 %230  ;;  %v229_v26 = vpop.permute.xlu0 %228 }
  0xc8   : > { %254 = vst.msk [vmem:[%s566_s22 + $0x9] sm:$0xff] %vm252_vm3, %v231_v25  ;;  %253 = vst.msk [vmem:[%s566_s22 + $0x1] sm:$0xff] %vm252_vm3, %v229_v26 }
  0xcb   : > { %v235_v27 = vpop.permute.xlu1 %234  ;;  %v233_v28 = vpop.permute.xlu0 %232 }
  0xcc   : > { %256 = vst.msk [vmem:[%s566_s22 + $0x21] sm:$0xff] %vm252_vm3, %v235_v27  ;;  %255 = vst.msk [vmem:[%s566_s22 + $0x19] sm:$0xff] %vm252_vm3, %v233_v28 }
  0xcf   : > { %v239_v29 = vpop.permute.xlu1 %238  ;;  %v237_v30 = vpop.permute.xlu0 %236 }
  0xd0   : > { %258 = vst.msk [vmem:[%s566_s22 + $0x39] sm:$0xff] %vm252_vm3, %v239_v29  ;;  %257 = vst.msk [vmem:[%s566_s22 + $0x31] sm:$0xff] %vm252_vm3, %v237_v30 }
  0xd3   : > { %v243_v31 = vpop.permute.xlu1 %242  ;;  %v241_v32 = vpop.permute.xlu0 %240 }
  0xd4   : > { %260 = vst.msk [vmem:[%s566_s22 + $0x51] sm:$0xff] %vm252_vm3, %v243_v31  ;;  %259 = vst.msk [vmem:[%s566_s22 + $0x49] sm:$0xff] %vm252_vm3, %v241_v32 }
  0xd5 PF: > { %p11_p7 = scmp.ge.s32.totalorder %s491_s11, 4   ;;  %s650_s6 = smov %s442_s7 }
  0xd6   : > { %s651_s7 = smov %s446_s8  ;;  %s652_s8 = smov %s501_s14 }
  0xd7   : > { %s653_s9 = smov %s491_s11  ;;  %13 = sbr.rel (!%p11_p7) target bundleno = 3 (0x3), region = 64 }
  0xde   :  { %282 = vsyncpa [#allocation3], 1 }
  0xdf   :  { %284 = vsyncpa [#allocation3 + $0x1], 1 }

</bundles_post_ra>
